<compile_context>
chip_gen: v5e
topology: v5e:2x2
jax: 0.10.0
libtpu: 0.0.40
codegen_flags: <defaults>
</compile_context>

<pallas_src>
import functools

import jax
import jax.numpy as jnp
from jax.experimental import pallas as pl
from jax.experimental.pallas import tpu as pltpu

A_DIM = 1
ACTION_NUM = 3
SERVICE_NUM = 20
S_DIM = SERVICE_NUM + ACTION_NUM * 3 + 1  # = 30
HIDDEN = 30

# Packed layout constants.
ONES_LANE = S_DIM + A_DIM          # 31: the constant-1 lane in the activation
K_IN = S_DIM + A_DIM + 1           # 32: [s | a | 1]
BIAS_UNIT = HIDDEN                 # 30: hidden "bias unit" carrying bo
H_PACK = 32                        # 30 hidden + 1 bias unit + 1 pad
O_PAD = 128                        # lane-dense output tile (unmasked stores)

MAX_BATCH_TILE = 512               # rows per grid step (multiple of 8)


def _round_up(x, m):
    return (x + m - 1) // m * m


def _cnet_kernel(sa_ref, w1_ref, w2_ref, out_ref):
    """Whole CNet forward for one batch tile.

    sa_ref : (TB, 32)    packed [s | a | 1]
    w1_ref : (32, 32)    fused layer-1 weights (+ biases in row 31)
    w2_ref : (32, 128)   output weights (+ bo at [30, 0])
    out_ref: (TB, 128)   q-value in column 0
    """
    h = jnp.maximum(
        jnp.dot(sa_ref[...], w1_ref[...], preferred_element_type=jnp.float32),
        0.0)
    out_ref[...] = jnp.dot(h, w2_ref[...], preferred_element_type=jnp.float32)


def pack_cnet_params(params):
    """One-time packing of raw (PyTorch-layout) params into kernel slabs."""
    ws = params["ws"].astype(jnp.float32)   # (30, s_dim)
    wa = params["wa"].astype(jnp.float32)   # (30, a_dim)
    wo = params["wo"].astype(jnp.float32)   # (1, 30)
    bs = params["bs"].astype(jnp.float32)   # (30,)
    ba = params["ba"].astype(jnp.float32)   # (30,)
    bo = params["bo"].astype(jnp.float32)   # (1,)

    w1 = jnp.zeros((K_IN, H_PACK), jnp.float32)
    w1 = w1.at[:S_DIM, :HIDDEN].set(ws.T)                     # s -> hidden
    w1 = w1.at[S_DIM:S_DIM + A_DIM, :HIDDEN].set(wa.T)        # a -> hidden
    w1 = w1.at[ONES_LANE, :HIDDEN].set(bs + ba)               # fused layer-1 bias
    w1 = w1.at[ONES_LANE, BIAS_UNIT].set(1.0)                 # h[BIAS_UNIT] = relu(1) = 1

    w2 = jnp.zeros((H_PACK, O_PAD), jnp.float32)
    w2 = w2.at[:HIDDEN, 0].set(wo[0, :])                      # hidden -> q
    w2 = w2.at[BIAS_UNIT, 0].set(bo[0])                       # + bo via bias unit

    return {"w1": w1, "w2": w2}


@jax.jit
def cnet_forward(s, a, packed):
    """s: (B, S_DIM) f32, a: (B, A_DIM) f32, packed: pack_cnet_params(...) -> (B, 1) f32."""
    B = s.shape[0]
    tb = min(MAX_BATCH_TILE, _round_up(B, 8))
    b_pad = _round_up(B, tb)
    num_blocks = b_pad // tb

    # Per-call glue: pack [s | a | 1] and pad batch to a tile multiple.
    ones = jnp.ones((B, 1), jnp.float32)
    sa = jnp.concatenate(
        [s.astype(jnp.float32), a.astype(jnp.float32), ones], axis=1)  # (B, 32)
    if b_pad != B:
        sa = jnp.pad(sa, ((0, b_pad - B), (0, 0)))

    out = pl.pallas_call(
        _cnet_kernel,
        out_shape=jax.ShapeDtypeStruct((b_pad, O_PAD), jnp.float32),
        grid=(num_blocks,),
        in_specs=[
            pl.BlockSpec((tb, K_IN), lambda i: (i, 0)),
            pl.BlockSpec((K_IN, H_PACK), lambda i: (0, 0)),
            pl.BlockSpec((H_PACK, O_PAD), lambda i: (0, 0)),
        ],
        out_specs=pl.BlockSpec((tb, O_PAD), lambda i: (i, 0)),
        compiler_params=pltpu.CompilerParams(
            dimension_semantics=("parallel",)),
    )(sa, packed["w1"], packed["w2"])

    return out[:B, :1]


def init_cnet_params(key):
    """Matches CNet.__init__: weights ~ N(0, 0.1); biases ~ PyTorch default U(-1/sqrt(fan_in), ...)."""
    k = jax.random.split(key, 6)
    ws = 0.1 * jax.random.normal(k[0], (HIDDEN, S_DIM), jnp.float32)
    wa = 0.1 * jax.random.normal(k[1], (HIDDEN, A_DIM), jnp.float32)
    wo = 0.1 * jax.random.normal(k[2], (1, HIDDEN), jnp.float32)
    bs = jax.random.uniform(k[3], (HIDDEN,), jnp.float32,
                            -1.0 / jnp.sqrt(S_DIM), 1.0 / jnp.sqrt(S_DIM))
    ba = jax.random.uniform(k[4], (HIDDEN,), jnp.float32,
                            -1.0 / jnp.sqrt(A_DIM), 1.0 / jnp.sqrt(A_DIM))
    bo = jax.random.uniform(k[5], (1,), jnp.float32,
                            -1.0 / jnp.sqrt(HIDDEN), 1.0 / jnp.sqrt(HIDDEN))
    return {"ws": ws, "bs": bs, "wa": wa, "ba": ba, "wo": wo, "bo": bo}


def cnet_reference(s, a, p):
    x = s @ p["ws"].T + p["bs"]
    y = a @ p["wa"].T + p["ba"]
    return jnp.maximum(x + y, 0.0) @ p["wo"].T + p["bo"]


if __name__ == "__main__":
    key = jax.random.PRNGKey(0)
    kp, ks, ka, ks2, ka2 = jax.random.split(key, 5)

    params = init_cnet_params(kp)
    packed = jax.block_until_ready(pack_cnet_params(params))  # one-time packing

    # Small batch (single grid step).
    batch = 4
    s = jax.random.normal(ks, (batch, S_DIM), jnp.float32)
    a = jax.random.normal(ka, (batch, A_DIM), jnp.float32)
    q = jax.block_until_ready(cnet_forward(s, a, packed))
    q_ref = cnet_reference(s, a, params)
    assert q.shape == (batch, 1)
    assert jnp.allclose(q, q_ref, atol=1e-5, rtol=1e-5), (q, q_ref)

    # Larger, non-tile-multiple batch (exercises grid > 1 + batch padding).
    batch2 = 1000
    s2 = jax.random.normal(ks2, (batch2, S_DIM), jnp.float32)
    a2 = jax.random.normal(ka2, (batch2, A_DIM), jnp.float32)
    q2 = jax.block_until_ready(cnet_forward(s2, a2, packed))
    q2_ref = cnet_reference(s2, a2, params)
    assert q2.shape == (batch2, 1)
    assert jnp.allclose(q2, q2_ref, atol=1e-4, rtol=1e-4), "large-batch mismatch"

    print("KERNEL_OK")
</pallas_src>

<mosaic_0001>
module attributes {stable_mosaic.version = 11 : i64} {
  func.func @_cnet_kernel(%arg0: i32, %arg1: memref<8x32xf32, #tpu.memory_space<vmem>>, %arg2: memref<32x32xf32, #tpu.memory_space<vmem>>, %arg3: memref<32x128xf32, #tpu.memory_space<vmem>>, %arg4: memref<8x128xf32, #tpu.memory_space<vmem>>) attributes {dimension_semantics = [#tpu.dimension_semantics<parallel>], iteration_bounds = array<i64: 1>, scalar_prefetch = 0 : i64, scratch_operands = 0 : i64, tpu.core_type = #tpu.core_type<tc>, window_params = [{transform_indices = @transform_0, window_bounds = array<i64: 8, 32>}, {pipeline_mode = #tpu.pipeline_mode<synchronous>, transform_indices = @transform_1, window_bounds = array<i64: 32, 32>}, {pipeline_mode = #tpu.pipeline_mode<synchronous>, transform_indices = @transform_2, window_bounds = array<i64: 32, 128>}, {transform_indices = @transform_3, window_bounds = array<i64: 8, 128>}]} {
    %c0 = arith.constant 0 : index
    %c0_0 = arith.constant 0 : index
    %0 = vector.load %arg1[%c0, %c0_0] : memref<8x32xf32, #tpu.memory_space<vmem>>, vector<8x32xf32>
    %c0_1 = arith.constant 0 : index
    %c0_2 = arith.constant 0 : index
    %1 = vector.load %arg2[%c0_1, %c0_2] : memref<32x32xf32, #tpu.memory_space<vmem>>, vector<32x32xf32>
    %cst = arith.constant dense<0.000000e+00> : vector<8x32xf32>
    %2 = tpu.matmul %0, %1, %cst {dimension_numbers = #tpu.dot_dimension_numbers<[1], [0], [0], [1], [0, 0, 1, 1], [], []>} : vector<8x32xf32>, vector<32x32xf32>, vector<8x32xf32> -> vector<8x32xf32>
    %cst_3 = arith.constant 0.000000e+00 : f32
    %3 = vector.broadcast %cst_3 : f32 to vector<8x32xf32>
    %4 = arith.maximumf %2, %3 : vector<8x32xf32>
    %c0_4 = arith.constant 0 : index
    %c0_5 = arith.constant 0 : index
    %5 = vector.load %arg3[%c0_4, %c0_5] : memref<32x128xf32, #tpu.memory_space<vmem>>, vector<32x128xf32>
    %cst_6 = arith.constant dense<0.000000e+00> : vector<8x128xf32>
    %6 = tpu.matmul %4, %5, %cst_6 {dimension_numbers = #tpu.dot_dimension_numbers<[1], [0], [0], [1], [0, 0, 1, 1], [], []>} : vector<8x32xf32>, vector<32x128xf32>, vector<8x128xf32> -> vector<8x128xf32>
    %c0_7 = arith.constant 0 : index
    %c0_8 = arith.constant 0 : index
    %7 = vector.load %arg4[%c0_7, %c0_8] : memref<8x128xf32, #tpu.memory_space<vmem>>, vector<8x128xf32>
    tpu.vector_store %arg4[%c0_7, %c0_8], %6 {strides = array<i32>} : memref<8x128xf32, #tpu.memory_space<vmem>>, vector<8x128xf32>,
    return
  }
  func.func @transform_0(%arg0: i32) -> (i32, i32) {
    %c0_i32 = arith.constant 0 : i32
    %c0_i32_0 = arith.constant 0 : i32
    return %arg0, %c0_i32 : i32, i32
  }
  func.func @transform_1(%arg0: i32) -> (i32, i32) {
    %c0_i32 = arith.constant 0 : i32
    %c0_i32_0 = arith.constant 0 : i32
    %c0_i32_1 = arith.constant 0 : i32
    return %c0_i32, %c0_i32_0 : i32, i32
  }
  func.func @transform_2(%arg0: i32) -> (i32, i32) {
    %c0_i32 = arith.constant 0 : i32
    %c0_i32_0 = arith.constant 0 : i32
    %c0_i32_1 = arith.constant 0 : i32
    return %c0_i32, %c0_i32_0 : i32, i32
  }
  func.func @transform_3(%arg0: i32) -> (i32, i32) {
    %c0_i32 = arith.constant 0 : i32
    %c0_i32_0 = arith.constant 0 : i32
    return %arg0, %c0_i32 : i32, i32
  }
}

</mosaic_0001>

<bundles_post_ra>
// kernel: cnet_forward.1
= control target key start
LH: loop header
LB: loop body
LE: loop exit
PB: predicated region body
PF: predicated region fallthrough
CT: control target
= control target key end

     0   :  { %8 = vsyncpa [#allocation3], 0  ;;  %s204_s0 = inlined_call_operand.vmem [shape: f32[8,32], index: 0, kind: input, shape index: {}]   ;;  %s205_s1 = inlined_call_operand.hbm [shape: f32[32,32], index: 1, kind: input, shape index: {}]   ;;  %s206_s2 = inlined_call_operand.hbm [shape: f32[32,128], index: 2, kind: input, shape index: {}]   ;;  %s207_s3 = inlined_call_operand.vmem [shape: f32[8,128], index: 3, kind: output, shape index: {}]  }
   0x1   :  { %s16_s14 = sshll.u32 %s205_s1, 4  ;;  %s17_s14 = int_to_ptr.hbm [resolvable:$true] %s16_s14 }
   0x2   :  { %9 = vsyncpa [#allocation5], 0  ;;  %s168_s15 = smov [#allocation2]   ;;  %s29_s19 = sshll.u32 %s206_s2, 4  ;;  %s30_s19 = int_to_ptr.hbm [resolvable:$true] %s29_s19 }
   0x3   :  { %s18_s16 = sshll.u32 %s168_s15, 4  ;;  %s169_s20 = smov 128   ;;  %s19_s16 = int_to_ptr.vmem [resolvable:$true] %s18_s16 }
   0x4   :  { %s170_s21 = smov 8   ;;  %s171_s22 = smov [#allocation4]  }
   0x5   :  { %24 = dma.hbm_to_vmem [thread:$0]  %s17_s14, 512, %s19_s16, [#allocation3], %s169_s20, %s169_s20, %s170_s21  }
   0x6   :  { %s31_s23 = sshll.u32 %s171_s22, 4  ;;  %s32_s23 = int_to_ptr.vmem [resolvable:$true] %s31_s23 }
   0x7   :  { %37 = dma.hbm_to_vmem [thread:$0]  %s30_s19, 512, %s32_s23, [#allocation5], %s169_s20, %s169_s20, %s170_s21  }
   0x8   :  { %164 = dma.done.wait [#allocation3], 512  }
   0x9   :  { %165 = vsyncadd [#allocation3], 4294966784 }
   0xa   :  { %166 = dma.done.wait [#allocation5], 512  }
   0xb   :  { %167 = vsyncadd [#allocation5], 4294966784  ;;  %v50_v0 = vld [vmem:[#allocation2 + $0x18] sm:$0xff]  ;;  %v49_v1 = vld [vmem:[#allocation2 + $0x10] sm:$0xff]  ;;  %vm51_vm0 = vcmask 261120  }
   0xc   :  { %67 = vmatpush.msra.mxu0 %v50_v0  ;;  %v79_v2 = vld [vmem:[#allocation4 + $0x18] sm:$0xff]  ;;  %v48_v3 = vld [vmem:[#allocation2 + $0x8] sm:$0xff]  ;;  %v78_v4 = vld [vmem:[#allocation4 + $0x10] sm:$0xff] }
   0xd   :  { %95 = vmatpush.msra.mxu1 %v79_v2  ;;  %v47_v5 = vld [vmem:[#allocation2] sm:$0xff]  ;;  %v77_v7 = vld [vmem:[#allocation4 + $0x8] sm:$0xff] }
   0xe   :  { %68 = vmatpush.msra.mxu0 %v49_v1  ;;  %v46_v6 = vld [vmem:[%s204_s0] sm:$0xff] }
   0xf   :  { %96 = vmatpush.msra.mxu1 %v78_v4  ;;  %v76_v8 = vld [vmem:[#allocation4] sm:$0xff] }
  0x10   :  { %69 = vmatpush.msra.mxu0 %v48_v3 }
  0x11   :  { %97 = vmatpush.msra.mxu1 %v77_v7 }
  0x12   :  { %70 = vmatpush.msra.mxu0 %v47_v5 }
  0x13   :  { %110 = vmatmul.msk.f32.vlgmr.msra.gmra.mxu0 %vm51_vm0, %v46_v6  ;;  %98 = vmatpush.msra.mxu1 %v76_v8 }
  0x90   :  { %v72_v9 = vpop.f32.mrf.mxu0 }
  0x91   :  { %v75_v10 = vmax.f32 %v72_v9, 0.0 }
  0x93   :  { %111 = vmatmul.msk.f32.vlgmr.msra.gmra.mxu1 %vm51_vm0, %v75_v10 }
 0x110   :  { %v100_v11 = vpop.f32.mrf.mxu1 }
 0x111   :  { %103 = vst [vmem:[%s207_s3] sm:$0xff] %v100_v11 }
 0x112   :  { %108 = vsyncpa [#allocation3], 1 }
 0x113   :  { %109 = vsyncpa [#allocation5], 1 }

</bundles_post_ra>
